<compile_context>
chip_gen: v6e
topology: v6e:2x2x1
jax: 0.10.0
libtpu: 0.0.40
codegen_flags: <defaults>
</compile_context>

<pallas_src>
import functools
from typing import NamedTuple, Optional

import jax
import jax.numpy as jnp
from jax.experimental import pallas as pl
from jax.experimental.pallas import tpu as pltpu


def _round_up(x, m):
    return (x + m - 1) // m * m


class Params(NamedTuple):
    n_primitives: int = 8
    prune_primitives: bool = True
    dims_factor: float = 3.0
    prob_factor: float = 5.0


class Primitives(NamedTuple):
    dims: jnp.ndarray
    quat: jnp.ndarray
    trans: jnp.ndarray
    exist: jnp.ndarray
    prob: Optional[jnp.ndarray] = None
    log_prob: Optional[jnp.ndarray] = None


# ----------------------------------------------------------------------------- kernel
def _primitives_kernel(
    feat_ref,    # VMEM (tile_B, C)          feature tile
    w_ref,       # VMEM (C, W_LANES)         fused weight  [dims|quat_cm|trans|prob|pad]
    b_ref,       # VMEM (1, W_LANES)         fused bias
    u_ref,       # VMEM (tile_B, P)          uniform(0,1) samples for Bernoulli
    out_ref,     # VMEM (tile_B, OUT_LANES)  fused lane-dense output slab
    *, n_primitives, dims_factor, prob_factor, out_lanes,
):
    P = n_primitives
    f = feat_ref[...]

    # One fused matmul for all four heads; accumulate in f32 on the MXU.
    y = jnp.dot(f, w_ref[...], preferred_element_type=jnp.float32) + b_ref[...]

    d  = y[:, 0 * P:3 * P]      # dims logits       (primitive-major)
    q0 = y[:, 3 * P:4 * P]      # quat component 0  (component-major slabs)
    q1 = y[:, 4 * P:5 * P]
    q2 = y[:, 5 * P:6 * P]
    q3 = y[:, 6 * P:7 * P]
    t  = y[:, 7 * P:10 * P]     # trans logits      (primitive-major)
    z  = y[:, 10 * P:11 * P]    # prob logits

    # dims: 0.5 * sigmoid(dims_factor * x)
    out_ref[:, 0:3 * P] = 0.5 * jax.nn.sigmoid(dims_factor * d)

    # quat: F.normalize(..., dim=-1, eps=1e-12) over the 4 components per primitive.
    # rsqrt(max(sumsq, eps^2)) == 1 / max(||q||, eps); single EUP op.
    inv = jax.lax.rsqrt(jnp.maximum(q0 * q0 + q1 * q1 + q2 * q2 + q3 * q3,
                                    jnp.float32(1e-24)))
    out_ref[:, 3 * P:4 * P] = q0 * inv
    out_ref[:, 4 * P:5 * P] = q1 * inv
    out_ref[:, 5 * P:6 * P] = q2 * inv
    out_ref[:, 6 * P:7 * P] = q3 * inv

    # trans: 0.5 * tanh(x)
    out_ref[:, 7 * P:10 * P] = 0.5 * jnp.tanh(t)

    # prob head: sigmoid(prob_factor * x); Bernoulli sample via precomputed uniforms;
    # log_prob from the logit via log_sigmoid (NaN/-inf safe at saturation).
    s = prob_factor * z
    prob = jax.nn.sigmoid(s)
    out_ref[:, 10 * P:11 * P] = prob

    exist = (u_ref[...] < prob).astype(jnp.float32)
    out_ref[:, 11 * P:12 * P] = exist
    out_ref[:, 12 * P:13 * P] = (exist * jax.nn.log_sigmoid(s)
                                 + (1.0 - exist) * jax.nn.log_sigmoid(-s))

    # Zero the pad lanes so the output slab is fully defined.
    if out_lanes > 13 * P:
        out_ref[:, 13 * P:out_lanes] = jnp.zeros(
            (out_ref.shape[0], out_lanes - 13 * P), jnp.float32)


# ------------------------------------------------------------------------ host helpers
def init_weights(key, n_input_channels, params):
    """Synthetic weights matching the PyTorch module's shapes/biases.

    dims/quat/prob use a small normal init (the repo's external weights_init());
    trans uses PyTorch's default Linear init U(-1/sqrt(C), 1/sqrt(C)).
    Returned in PyTorch layout: W (N, C), b (N,).
    """
    # TODO(synk): weights_init() in the original repo is an external initializer;
    # a deterministic normal(0, 0.02) stand-in is used here.
    C, P = n_input_channels, params.n_primitives
    ks = jax.random.split(key, 4)

    Wd = 0.02 * jax.random.normal(ks[0], (3 * P, C), jnp.float32)
    bd = jnp.tile(jnp.array([-3.0, -3.0, -3.0], jnp.float32) / params.dims_factor, P)

    Wq = 0.02 * jax.random.normal(ks[1], (4 * P, C), jnp.float32)
    bq = jnp.tile(jnp.array([1.0, 0.0, 0.0, 0.0], jnp.float32), P)  # primitive-major

    bound = 1.0 / (C ** 0.5)
    kt1, kt2 = jax.random.split(ks[2])
    Wt = jax.random.uniform(kt1, (3 * P, C), jnp.float32, -bound, bound)
    bt = jax.random.uniform(kt2, (3 * P,), jnp.float32, -bound, bound)

    Wp = 0.02 * jax.random.normal(ks[3], (P, C), jnp.float32)
    bp = jnp.zeros((P,), jnp.float32).at[0].set(2.5 / params.prob_factor)

    return dict(dims=(Wd, bd), quat=(Wq, bq), trans=(Wt, bt), prob=(Wp, bp))


def pack_weights(weights, params):
    """Fuse the four heads into one (C, W_LANES) weight + (1, W_LANES) bias.

    Column layout: dims(3P) | quat(4P, reordered to component-major col=c*P+p) |
    trans(3P) | prob(P) | zero-pad to a multiple of 128 lanes.
    """
    P = params.n_primitives
    Wd, bd = weights["dims"]
    Wq, bq = weights["quat"]
    Wt, bt = weights["trans"]
    Wp, bp = weights["prob"]
    C = Wd.shape[1]

    # quat: primitive-major (p*4+c) -> component-major (c*P+p)
    Wq_cm = Wq.reshape(P, 4, C).transpose(1, 0, 2).reshape(4 * P, C)
    bq_cm = bq.reshape(P, 4).T.reshape(4 * P)

    W = jnp.concatenate([Wd, Wq_cm, Wt, Wp], axis=0)      # (11P, C)
    b = jnp.concatenate([bd, bq_cm, bt, bp], axis=0)      # (11P,)

    lanes = _round_up(11 * P, 128)
    pad = lanes - 11 * P
    if pad:
        W = jnp.pad(W, ((0, pad), (0, 0)))
        b = jnp.pad(b, ((0, pad),))
    return dict(w=jnp.asarray(W).T, b=b.reshape(1, lanes))  # (C, lanes), (1, lanes)


# ---------------------------------------------------------------------------- wrapper
def primitives_prediction(feature, packed, params, key, *,
                          block_b=512, matmul_dtype=jnp.float32):
    B, C = feature.shape
    P = params.n_primitives

    w = packed["w"].astype(matmul_dtype)
    b = packed["b"].astype(jnp.float32)
    W_LANES = w.shape[1]
    OUT_LANES = _round_up(13 * P, 128)

    # Bernoulli uniforms drawn outside the kernel (portable: works on-HW and in
    # interpret mode); compare + log_prob happen inside the kernel.
    u = jax.random.uniform(key, (B, P), jnp.float32)

    # Batch tiling: single block for small B, 512-row tiles (x2 double-buffered
    # by the pipeline) otherwise.  512 rows * 128 lanes * f32 stays well inside
    # v7x's 32 MiB default scoped VMEM even with weights resident.
    block_B = B if B <= block_b else block_b
    grid = (pl.cdiv(B, block_B),)

    kernel = functools.partial(
        _primitives_kernel,
        n_primitives=P,
        dims_factor=float(params.dims_factor),
        prob_factor=float(params.prob_factor),
        out_lanes=OUT_LANES,
    )

    out = pl.pallas_call(
        kernel,
        out_shape=jax.ShapeDtypeStruct((B, OUT_LANES), jnp.float32),
        grid=grid,
        in_specs=[
            pl.BlockSpec((block_B, C), lambda i: (i, 0)),        # feature tile
            pl.BlockSpec((C, W_LANES), lambda i: (0, 0)),        # fused weight (pinned)
            pl.BlockSpec((1, W_LANES), lambda i: (0, 0)),        # fused bias (pinned)
            pl.BlockSpec((block_B, P), lambda i: (i, 0)),        # uniforms tile
        ],
        out_specs=pl.BlockSpec((block_B, OUT_LANES), lambda i: (i, 0)),
        compiler_params=pltpu.CompilerParams(
            dimension_semantics=("parallel",)),
    )(feature.astype(matmul_dtype), w, b, u)

    # Split the lane-dense slab back into the module's outputs (free layout plumbing).
    dims = out[:, 0:3 * P].reshape(B, P, 3)
    quat = out[:, 3 * P:7 * P].reshape(B, 4, P).transpose(0, 2, 1)   # -> (B, P, 4)
    trans = out[:, 7 * P:10 * P].reshape(B, P, 3)
    prob = out[:, 10 * P:11 * P]
    exist = out[:, 11 * P:12 * P]
    log_prob = out[:, 12 * P:13 * P]

    if not params.prune_primitives:
        prob = jnp.ones((B, P), jnp.float32)
        exist = prob
        log_prob = None

    return Primitives(dims=dims, quat=quat, trans=trans,
                      exist=exist, prob=prob, log_prob=log_prob)


# ------------------------------------------------------------------------------- main
if __name__ == "__main__":
    B, C, P = 2, 64, 8
    params = Params(n_primitives=P, prune_primitives=True,
                    dims_factor=3.0, prob_factor=5.0)

    key = jax.random.PRNGKey(0)
    k_feat, k_w, k_sample = jax.random.split(key, 3)
    feature = jax.random.normal(k_feat, (B, C), jnp.float32)
    weights = init_weights(k_w, C, params)
    packed = pack_weights(weights, params)

    prims = primitives_prediction(feature, packed, params, k_sample)
    jax.block_until_ready((prims.dims, prims.quat, prims.trans,
                           prims.exist, prims.prob, prims.log_prob))

    assert prims.dims.shape == (B, P, 3)
    assert prims.quat.shape == (B, P, 4)
    assert prims.trans.shape == (B, P, 3)
    assert prims.prob.shape == (B, P)
    assert prims.exist.shape == (B, P)
    assert prims.log_prob.shape == (B, P)
    # quaternions are unit-norm
    assert bool(jnp.allclose(jnp.linalg.norm(prims.quat, axis=-1), 1.0, atol=1e-5))
    # dims/trans ranges and prob in (0,1)
    assert bool(jnp.all((prims.dims > 0.0) & (prims.dims < 0.5)))
    assert bool(jnp.all(jnp.abs(prims.trans) <= 0.5))
    assert bool(jnp.all((prims.prob > 0.0) & (prims.prob < 1.0)))
    # exist is {0,1}; log_prob finite (no NaN/-inf even if sigmoid saturates)
    assert bool(jnp.all((prims.exist == 0.0) | (prims.exist == 1.0)))
    assert bool(jnp.all(jnp.isfinite(prims.log_prob)))

    print("KERNEL_OK")
</pallas_src>

<mosaic_0001>
module attributes {stable_mosaic.version = 11 : i64} {
  func.func @_primitives_kernel(%arg0: i32, %arg1: memref<2x64xf32, #tpu.memory_space<vmem>>, %arg2: memref<64x128xf32, #tpu.memory_space<vmem>>, %arg3: memref<1x128xf32, #tpu.memory_space<vmem>>, %arg4: memref<2x8xf32, #tpu.memory_space<vmem>>, %arg5: memref<2x128xf32, #tpu.memory_space<vmem>>) attributes {dimension_semantics = [#tpu.dimension_semantics<parallel>], iteration_bounds = array<i64: 1>, scalar_prefetch = 0 : i64, scratch_operands = 0 : i64, tpu.core_type = #tpu.core_type<tc>, window_params = [{transform_indices = @transform_0, window_bounds = array<i64: 2, 64>}, {pipeline_mode = #tpu.pipeline_mode<synchronous>, transform_indices = @transform_1, window_bounds = array<i64: 64, 128>}, {pipeline_mode = #tpu.pipeline_mode<synchronous>, transform_indices = @transform_2, window_bounds = array<i64: 1, 128>}, {transform_indices = @transform_3, window_bounds = array<i64: 2, 8>}, {transform_indices = @transform_4, window_bounds = array<i64: 2, 128>}]} {
    %c0 = arith.constant 0 : index
    %c0_0 = arith.constant 0 : index
    %0 = vector.load %arg1[%c0, %c0_0] : memref<2x64xf32, #tpu.memory_space<vmem>>, vector<2x64xf32>
    %c0_1 = arith.constant 0 : index
    %c0_2 = arith.constant 0 : index
    %1 = vector.load %arg2[%c0_1, %c0_2] : memref<64x128xf32, #tpu.memory_space<vmem>>, vector<64x128xf32>
    %cst = arith.constant dense<0.000000e+00> : vector<2x128xf32>
    %2 = tpu.matmul %0, %1, %cst {dimension_numbers = #tpu.dot_dimension_numbers<[1], [0], [0], [1], [0, 0, 1, 1], [], []>} : vector<2x64xf32>, vector<64x128xf32>, vector<2x128xf32> -> vector<2x128xf32>
    %c0_3 = arith.constant 0 : index
    %c0_4 = arith.constant 0 : index
    %3 = vector.load %arg3[%c0_3, %c0_4] : memref<1x128xf32, #tpu.memory_space<vmem>>, vector<1x128xf32>
    %4 = vector.broadcast %3 : vector<1x128xf32> to vector<2x128xf32>
    %5 = arith.addf %2, %4 : vector<2x128xf32>
    %6 = vector.extract_strided_slice %5 {offsets = [0, 0], sizes = [2, 24], strides = [1, 1]} : vector<2x128xf32> to vector<2x24xf32>
    %7 = vector.extract_strided_slice %5 {offsets = [0, 24], sizes = [2, 8], strides = [1, 1]} : vector<2x128xf32> to vector<2x8xf32>
    %8 = vector.extract_strided_slice %5 {offsets = [0, 32], sizes = [2, 8], strides = [1, 1]} : vector<2x128xf32> to vector<2x8xf32>
    %9 = vector.extract_strided_slice %5 {offsets = [0, 40], sizes = [2, 8], strides = [1, 1]} : vector<2x128xf32> to vector<2x8xf32>
    %10 = vector.extract_strided_slice %5 {offsets = [0, 48], sizes = [2, 8], strides = [1, 1]} : vector<2x128xf32> to vector<2x8xf32>
    %11 = vector.extract_strided_slice %5 {offsets = [0, 56], sizes = [2, 24], strides = [1, 1]} : vector<2x128xf32> to vector<2x24xf32>
    %12 = vector.extract_strided_slice %5 {offsets = [0, 80], sizes = [2, 8], strides = [1, 1]} : vector<2x128xf32> to vector<2x8xf32>
    %cst_5 = arith.constant 3.000000e+00 : f32
    %13 = vector.broadcast %cst_5 : f32 to vector<2x24xf32>
    %14 = arith.mulf %13, %6 : vector<2x24xf32>
    %15 = arith.negf %14 : vector<2x24xf32>
    %16 = math.exp %15 : vector<2x24xf32>
    %cst_6 = arith.constant 1.000000e+00 : f32
    %17 = vector.broadcast %cst_6 : f32 to vector<2x24xf32>
    %18 = arith.addf %17, %16 : vector<2x24xf32>
    %19 = arith.divf %17, %18 : vector<2x24xf32>
    %cst_7 = arith.constant 5.000000e-01 : f32
    %20 = vector.broadcast %cst_7 : f32 to vector<2x24xf32>
    %21 = arith.mulf %20, %19 : vector<2x24xf32>
    %c0_8 = arith.constant 0 : index
    %c0_9 = arith.constant 0 : index
    %22 = vector.load %arg5[%c0_8, %c0_9] : memref<2x128xf32, #tpu.memory_space<vmem>>, vector<2x24xf32>
    tpu.vector_store %arg5[%c0_8, %c0_9], %21 {strides = array<i32>} : memref<2x128xf32, #tpu.memory_space<vmem>>, vector<2x24xf32>,
    %23 = arith.mulf %7, %7 : vector<2x8xf32>
    %24 = arith.mulf %8, %8 : vector<2x8xf32>
    %25 = arith.addf %23, %24 : vector<2x8xf32>
    %26 = arith.mulf %9, %9 : vector<2x8xf32>
    %27 = arith.addf %25, %26 : vector<2x8xf32>
    %28 = arith.mulf %10, %10 : vector<2x8xf32>
    %29 = arith.addf %27, %28 : vector<2x8xf32>
    %cst_10 = arith.constant 1.000000e-24 : f32
    %30 = vector.broadcast %cst_10 : f32 to vector<2x8xf32>
    %31 = arith.maximumf %29, %30 : vector<2x8xf32>
    %32 = math.rsqrt %31 : vector<2x8xf32>
    %33 = arith.mulf %7, %32 : vector<2x8xf32>
    %c0_11 = arith.constant 0 : index
    %c24 = arith.constant 24 : index
    %34 = vector.load %arg5[%c0_11, %c24] : memref<2x128xf32, #tpu.memory_space<vmem>>, vector<2x8xf32>
    tpu.vector_store %arg5[%c0_11, %c24], %33 {strides = array<i32>} : memref<2x128xf32, #tpu.memory_space<vmem>>, vector<2x8xf32>,
    %35 = arith.mulf %8, %32 : vector<2x8xf32>
    %c0_12 = arith.constant 0 : index
    %c32 = arith.constant 32 : index
    %36 = vector.load %arg5[%c0_12, %c32] : memref<2x128xf32, #tpu.memory_space<vmem>>, vector<2x8xf32>
    tpu.vector_store %arg5[%c0_12, %c32], %35 {strides = array<i32>} : memref<2x128xf32, #tpu.memory_space<vmem>>, vector<2x8xf32>,
    %37 = arith.mulf %9, %32 : vector<2x8xf32>
    %c0_13 = arith.constant 0 : index
    %c40 = arith.constant 40 : index
    %38 = vector.load %arg5[%c0_13, %c40] : memref<2x128xf32, #tpu.memory_space<vmem>>, vector<2x8xf32>
    tpu.vector_store %arg5[%c0_13, %c40], %37 {strides = array<i32>} : memref<2x128xf32, #tpu.memory_space<vmem>>, vector<2x8xf32>,
    %39 = arith.mulf %10, %32 : vector<2x8xf32>
    %c0_14 = arith.constant 0 : index
    %c48 = arith.constant 48 : index
    %40 = vector.load %arg5[%c0_14, %c48] : memref<2x128xf32, #tpu.memory_space<vmem>>, vector<2x8xf32>
    tpu.vector_store %arg5[%c0_14, %c48], %39 {strides = array<i32>} : memref<2x128xf32, #tpu.memory_space<vmem>>, vector<2x8xf32>,
    %41 = math.tanh %11 : vector<2x24xf32>
    %cst_15 = arith.constant 5.000000e-01 : f32
    %42 = vector.broadcast %cst_15 : f32 to vector<2x24xf32>
    %43 = arith.mulf %42, %41 : vector<2x24xf32>
    %c0_16 = arith.constant 0 : index
    %c56 = arith.constant 56 : index
    %44 = vector.load %arg5[%c0_16, %c56] : memref<2x128xf32, #tpu.memory_space<vmem>>, vector<2x24xf32>
    tpu.vector_store %arg5[%c0_16, %c56], %43 {strides = array<i32>} : memref<2x128xf32, #tpu.memory_space<vmem>>, vector<2x24xf32>,
    %cst_17 = arith.constant 5.000000e+00 : f32
    %45 = vector.broadcast %cst_17 : f32 to vector<2x8xf32>
    %46 = arith.mulf %45, %12 : vector<2x8xf32>
    %47 = arith.negf %46 : vector<2x8xf32>
    %48 = math.exp %47 : vector<2x8xf32>
    %cst_18 = arith.constant 1.000000e+00 : f32
    %49 = vector.broadcast %cst_18 : f32 to vector<2x8xf32>
    %50 = arith.addf %49, %48 : vector<2x8xf32>
    %51 = arith.divf %49, %50 : vector<2x8xf32>
    %c0_19 = arith.constant 0 : index
    %c80 = arith.constant 80 : index
    %52 = vector.load %arg5[%c0_19, %c80] : memref<2x128xf32, #tpu.memory_space<vmem>>, vector<2x8xf32>
    tpu.vector_store %arg5[%c0_19, %c80], %51 {strides = array<i32>} : memref<2x128xf32, #tpu.memory_space<vmem>>, vector<2x8xf32>,
    %c0_20 = arith.constant 0 : index
    %c0_21 = arith.constant 0 : index
    %53 = vector.load %arg4[%c0_20, %c0_21] : memref<2x8xf32, #tpu.memory_space<vmem>>, vector<2x8xf32>
    %54 = arith.cmpf olt, %53, %51 : vector<2x8xf32>
    %55 = arith.extui %54 : vector<2x8xi1> to vector<2x8xi32>
    %56 = arith.sitofp %55 : vector<2x8xi32> to vector<2x8xf32>
    %c0_22 = arith.constant 0 : index
    %c88 = arith.constant 88 : index
    %57 = vector.load %arg5[%c0_22, %c88] : memref<2x128xf32, #tpu.memory_space<vmem>>, vector<2x8xf32>
    tpu.vector_store %arg5[%c0_22, %c88], %56 {strides = array<i32>} : memref<2x128xf32, #tpu.memory_space<vmem>>, vector<2x8xf32>,
    %cst_23 = arith.constant 0.000000e+00 : f32
    %58 = vector.broadcast %cst_23 : f32 to vector<2x8xf32>
    %59 = arith.subf %58, %46 : vector<2x8xf32>
    %cst_24 = arith.constant 0.000000e+00 : f32
    %60 = vector.broadcast %cst_24 : f32 to vector<2x8xf32>
    %61 = arith.maximumf %59, %60 : vector<2x8xf32>
    %62 = vector.broadcast %cst_24 : f32 to vector<2x8xf32>
    %63 = arith.subf %59, %62 : vector<2x8xf32>
    %64 = arith.cmpf one, %63, %63 : vector<2x8xf32>
    %65 = vector.broadcast %cst_24 : f32 to vector<2x8xf32>
    %66 = arith.addf %59, %65 : vector<2x8xf32>
    %67 = math.absf %63 : vector<2x8xf32>
    %cst_25 = arith.constant 0.000000e+00 : f32
    %68 = vector.broadcast %cst_25 : f32 to vector<2x8xf32>
    %69 = arith.subf %68, %67 : vector<2x8xf32>
    %70 = math.exp %69 : vector<2x8xf32>
    %71 = math.log1p %70 : vector<2x8xf32>
    %72 = arith.addf %61, %71 : vector<2x8xf32>
    %73 = arith.select %64, %66, %72 : vector<2x8xi1>, vector<2x8xf32>
    %cst_26 = arith.constant 0.000000e+00 : f32
    %74 = vector.broadcast %cst_26 : f32 to vector<2x8xf32>
    %75 = arith.subf %74, %73 : vector<2x8xf32>
    %76 = arith.mulf %56, %75 : vector<2x8xf32>
    %cst_27 = arith.constant 1.000000e+00 : f32
    %77 = vector.broadcast %cst_27 : f32 to vector<2x8xf32>
    %78 = arith.subf %77, %56 : vector<2x8xf32>
    %cst_28 = arith.constant 0.000000e+00 : f32
    %79 = vector.broadcast %cst_28 : f32 to vector<2x8xf32>
    %80 = arith.subf %79, %46 : vector<2x8xf32>
    %cst_29 = arith.constant 0.000000e+00 : f32
    %81 = vector.broadcast %cst_29 : f32 to vector<2x8xf32>
    %82 = arith.subf %81, %80 : vector<2x8xf32>
    %cst_30 = arith.constant 0.000000e+00 : f32
    %83 = vector.broadcast %cst_30 : f32 to vector<2x8xf32>
    %84 = arith.maximumf %82, %83 : vector<2x8xf32>
    %85 = vector.broadcast %cst_30 : f32 to vector<2x8xf32>
    %86 = arith.subf %82, %85 : vector<2x8xf32>
    %87 = arith.cmpf one, %86, %86 : vector<2x8xf32>
    %88 = vector.broadcast %cst_30 : f32 to vector<2x8xf32>
    %89 = arith.addf %82, %88 : vector<2x8xf32>
    %90 = math.absf %86 : vector<2x8xf32>
    %cst_31 = arith.constant 0.000000e+00 : f32
    %91 = vector.broadcast %cst_31 : f32 to vector<2x8xf32>
    %92 = arith.subf %91, %90 : vector<2x8xf32>
    %93 = math.exp %92 : vector<2x8xf32>
    %94 = math.log1p %93 : vector<2x8xf32>
    %95 = arith.addf %84, %94 : vector<2x8xf32>
    %96 = arith.select %87, %89, %95 : vector<2x8xi1>, vector<2x8xf32>
    %cst_32 = arith.constant 0.000000e+00 : f32
    %97 = vector.broadcast %cst_32 : f32 to vector<2x8xf32>
    %98 = arith.subf %97, %96 : vector<2x8xf32>
    %99 = arith.mulf %78, %98 : vector<2x8xf32>
    %100 = arith.addf %76, %99 : vector<2x8xf32>
    %c0_33 = arith.constant 0 : index
    %c96 = arith.constant 96 : index
    %101 = vector.load %arg5[%c0_33, %c96] : memref<2x128xf32, #tpu.memory_space<vmem>>, vector<2x8xf32>
    tpu.vector_store %arg5[%c0_33, %c96], %100 {strides = array<i32>} : memref<2x128xf32, #tpu.memory_space<vmem>>, vector<2x8xf32>,
    %cst_34 = arith.constant 0.000000e+00 : f32
    %102 = vector.broadcast %cst_34 : f32 to vector<2x24xf32>
    %c0_35 = arith.constant 0 : index
    %c104 = arith.constant 104 : index
    %103 = vector.load %arg5[%c0_35, %c104] : memref<2x128xf32, #tpu.memory_space<vmem>>, vector<2x24xf32>
    tpu.vector_store %arg5[%c0_35, %c104], %102 {strides = array<i32>} : memref<2x128xf32, #tpu.memory_space<vmem>>, vector<2x24xf32>,
    return
  }
  func.func @transform_0(%arg0: i32) -> (i32, i32) {
    %c0_i32 = arith.constant 0 : i32
    %c0_i32_0 = arith.constant 0 : i32
    return %arg0, %c0_i32 : i32, i32
  }
  func.func @transform_1(%arg0: i32) -> (i32, i32) {
    %c0_i32 = arith.constant 0 : i32
    %c0_i32_0 = arith.constant 0 : i32
    %c0_i32_1 = arith.constant 0 : i32
    return %c0_i32, %c0_i32_0 : i32, i32
  }
  func.func @transform_2(%arg0: i32) -> (i32, i32) {
    %c0_i32 = arith.constant 0 : i32
    %c0_i32_0 = arith.constant 0 : i32
    %c0_i32_1 = arith.constant 0 : i32
    return %c0_i32, %c0_i32_0 : i32, i32
  }
  func.func @transform_3(%arg0: i32) -> (i32, i32) {
    %c0_i32 = arith.constant 0 : i32
    %c0_i32_0 = arith.constant 0 : i32
    return %arg0, %c0_i32 : i32, i32
  }
  func.func @transform_4(%arg0: i32) -> (i32, i32) {
    %c0_i32 = arith.constant 0 : i32
    %c0_i32_0 = arith.constant 0 : i32
    return %arg0, %c0_i32 : i32, i32
  }
}

</mosaic_0001>

<bundles_post_ra>
// kernel: tpu_custom_call.1
= control target key start
LH: loop header
LB: loop body
LE: loop exit
PB: predicated region body
PF: predicated region fallthrough
CT: control target
= control target key end

     0   :  { %9 = vsyncpa [#allocation3], 0  ;;  %s512_s0 = inlined_call_operand.hbm [shape: f32[2,64], index: 0, kind: input, shape index: {}]   ;;  %s513_s1 = inlined_call_operand.hbm [shape: f32[64,128], index: 1, kind: input, shape index: {}]   ;;  %s514_s2 = inlined_call_operand.vmem [shape: f32[1,128], index: 2, kind: input, shape index: {}]   ;;  %s515_s3 = inlined_call_operand.vmem [shape: f32[2,8], index: 3, kind: input, shape index: {}]   ;;  %s516_s4 = inlined_call_operand.hbm [shape: f32[2,128], index: 4, kind: output, shape index: {}]  }
   0x1   :  { %10 = vsyncpa [#allocation6], 0 }
   0x2   :  { %11 = vsyncpa [#allocation4], 0  ;;  %s419_s15 = smov [#allocation2]   ;;  %s420_s17 = smov [#allocation5]  }
   0x3   :  { %s18_s16 = sshll.u32 %s419_s15, 4  ;;  %s27_s18 = sshll.u32 %s420_s17, 4  ;;  %s19_s16 = int_to_ptr.vmem [resolvable:$true] %s18_s16  ;;  %s28_s18 = int_to_ptr.vmem [resolvable:$true] %s27_s18 }
   0x4   :  { %s361_s19 = scalar_lea.vmem %s19_s16, 32  ;;  %p366_p1 = scmp.lt.s32.totalorder %s19_s16, %s19_s16 }
   0x5   :  { %p362_p0 = scmp.ne.s32.totalorder %s19_s16, %s361_s19  ;;  %p367_p2 = scmp.lt.s32.totalorder %s361_s19, %s361_s19 }
   0x7   :  { %p368_p3 = por %p367_p2, %p366_p1 }
   0x9   :  { %p369_p4 = pnand %p368_p3, %p362_p0 }
   0xb   :  { %372 = shalt.err (!%p369_p4)
}
   0xc   :  { %21 = dma.hbm_to_vmem [thread:$0]  %s512_s0, 32, %s19_s16, [#allocation3]  }
   0xd   :  { %s381_s22 = scalar_lea.vmem %s28_s18, 1024  ;;  %p386_p6 = scmp.lt.s32.totalorder %s28_s18, %s28_s18 }
   0xe   :  { %p382_p5 = scmp.ne.s32.totalorder %s28_s18, %s381_s22  ;;  %p387_p7 = scmp.lt.s32.totalorder %s381_s22, %s381_s22 }
  0x10   :  { %p388_p8 = por %p387_p7, %p386_p6 }
  0x12   :  { %p389_p9 = pnand %p388_p8, %p382_p5 }
  0x14   :  { %392 = shalt.err (!%p389_p9)
}
  0x15   :  { %s421_s23 = smov 128   ;;  %s422_s24 = smov 8  }
  0x16   :  { %33 = dma.hbm_to_vmem [thread:$0]  %s513_s1, 1024, %s28_s18, [#allocation6], %s421_s23, %s421_s23, %s422_s24  }
  0x17   :  { %413 = dma.done.wait [#allocation3], 32  }
  0x18   :  { %414 = vsyncadd [#allocation3], 4294967264 }
  0x19   :  { %415 = dma.done.wait [#allocation6], 1024  }
  0x1a   :  { %416 = vsyncadd [#allocation6], 4294966272  ;;  %v423_v0 = vmov 0.0   ;;  %vm424_vm0 = vmmov 0   ;;  %v52_v1 = vld [vmem:[#allocation5 + $0x38] sm:$0xff]  ;;  %v51_v2 = vld [vmem:[#allocation5 + $0x30] sm:$0xff] }
  0x1b   :  { %299 = vmatprep.subr.mxu0 %v423_v0  ;;  %315 = vmatprep.mubr.msk.f32.mxu0 %vm424_vm0, %v423_v0  ;;  %v50_v3 = vld [vmem:[#allocation5 + $0x28] sm:$0xff]  ;;  %v49_v4 = vld [vmem:[#allocation5 + $0x20] sm:$0xff]  ;;  %v48_v5 = vld [vmem:[#allocation5 + $0x18] sm:$0xff]  ;;  %vm60_vm1 = vcmask 523264   ;;  %s425_s27 = smov 104   ;;  %s426_s28 = smov 120  }
  0x1c   :  { %300 = vmatpush3.msra.mxu0 %v52_v1  ;;  %v47_v6 = vld [vmem:[#allocation5 + $0x10] sm:$0xff]  ;;  %v46_v7 = vld [vmem:[#allocation5 + $0x8] sm:$0xff]  ;;  %v45_v8 = vld [vmem:[#allocation5] sm:$0xff]  ;;  %s428_s29 = smov 48   ;;  %vm142_vm2 = vcmask 189440   ;;  %vm161_vm7 = vcmask 255168  }
  0x1d   :  { %301 = vmatprep.subr.mxu0 %v423_v0  ;;  %v44_v9 = vld [vmem:[#allocation2] sm:$0x3]  ;;  %s429_s30 = smov 16   ;;  %s430_s5 = smov 24   ;;  %vm168_vm9 = vcmask 320768   ;;  %vm174_vm10 = vcmask 386368  }
  0x1e   :  { %302 = vmatpush3.msra.mxu0 %v51_v2  ;;  %v285_v10 = vld [vmem:[%s514_s2] ss:$0 sm:$0xff]  ;;  %s427_s2 = smov 112   ;;  %s431_s8 = smov 88   ;;  %vm180_vm11 = vcmask 451968   ;;  %vm184_vm12 = vcmask 648640  }
  0x1f   :  { %303 = vmatprep.subr.mxu0 %v423_v0  ;;  %s432_s9 = smov 96   ;;  %vm193_vm13 = vcmask 714368   ;;  %vm207_vm14 = vcmask 779968   ;;  %vm265_vm15 = vcmask 845568   ;;  %vm267_vm0 = vcmask 1042240  }
  0x20   :  { %304 = vmatpush3.msra.mxu0 %v50_v3 }
  0x21   :  { %305 = vmatprep.subr.mxu0 %v423_v0 }
  0x22   :  { %306 = vmatpush3.msra.mxu0 %v49_v4 }
  0x23   :  { %307 = vmatprep.subr.mxu0 %v423_v0 }
  0x24   :  { %308 = vmatpush3.msra.mxu0 %v48_v5 }
  0x25   :  { %309 = vmatprep.subr.mxu0 %v423_v0 }
  0x26   :  { %310 = vmatpush3.msra.mxu0 %v47_v6 }
  0x27   :  { %311 = vmatprep.subr.mxu0 %v423_v0 }
  0x28   :  { %312 = vmatpush3.msra.mxu0 %v46_v7  ;;  %v195_v7 = vld [vmem:[%s515_s3] sm:$0x3]  ;;  %s433_s3 = smov [#allocation7]  }
  0x29   :  { %313 = vmatprep.subr.mxu0 %v423_v0  ;;  %s275_s10 = sshll.u32 %s433_s3, 4  ;;  %s276_s10 = int_to_ptr.vmem [resolvable:$true] %s275_s10 }
  0x2a   :  { %314 = vmatpush3.msra.mxu0 %v45_v8  ;;  %s393_s11 = scalar_lea.vmem %s276_s10, 32  ;;  %p398_p11 = scmp.lt.s32.totalorder %s276_s10, %s276_s10 }
  0x2b   :  { %316 = vmatmul.mubr.msk.f32.vlgmr.msra.gmra.mxu0 %vm60_vm1, %v44_v9  ;;  %p394_p10 = scmp.ne.s32.totalorder %s276_s10, %s393_s11  ;;  %p399_p12 = scmp.lt.s32.totalorder %s393_s11, %s393_s11 }
  0x2d   :  { %p400_p13 = por %p399_p12, %p398_p11 }
  0x2f   :  { %p401_p0 = pnand %p400_p13, %p394_p10 }
  0xeb   :  { %v130_v11 = vpop.f32.mrf.mxu0 }
  0xec   :  { %v478_v12 = vadd.f32 %v285_v10, %v130_v11 }
  0xed   :  { %v317_v13 = vpop.f32.mrf.mxu0 }
  0xee   :  { %v482_v14 = vmul.f32 %v478_v12, %v478_v12  ;;  %v288_v15 = vmul.f32 -5.0, %v478_v12  ;;  %v186_v16 = vmul.f32 5.0, %v478_v12  ;;  %v287_v17 = vmul.f32 -3.0, %v478_v12 }
  0xf0   :  { %154 = vrot.lane.b32.xlu1 %v482_v14, %s425_s27  ;;  %146 = vrot.lane.b32.xlu0 %v482_v14, %s426_s28  ;;  %v188_v18 = vmul.f32 1.442695, %v288_v15  ;;  %v209_v19 = vsub.f32 0.0, %v186_v16  ;;  %v136_v20 = vmul.f32 1.442695, %v287_v17 }
  0xf2   :  { %333 = vpow2.f32 %v188_v18  ;;  %v213_v21 = vand.u32 2147483647, %v209_v19  ;;  %v235_v22 = vsub.f32 0.0, %v209_v19  ;;  %v210_v48 = vmax.f32 %v209_v19, 0.0 }
  0xf3   :  { %335 = vpow2.f32 %v136_v20  ;;  %vm211_vm4 = vcmp.ne.f32.partialorder %v209_v19, %v209_v19 }
  0xf4   :  { %150 = vrot.lane.b32.xlu0 %v482_v14, %s427_s2  ;;  %v214_v23 = vsub.f32 0.0, %v213_v21  ;;  %v239_v24 = vand.u32 2147483647, %v235_v22  ;;  %v236_v54 = vmax.f32 %v235_v22, 0.0  ;;  %vm237_vm6 = vcmp.ne.f32.partialorder %v235_v22, %v235_v22 }
  0xf6   :  { %v215_v25 = vmul.f32 1.442695, %v214_v23  ;;  %v240_v26 = vsub.f32 0.0, %v239_v24 }
  0xf8   :  { %337 = vpow2.f32 %v215_v25  ;;  %v241_v27 = vmul.f32 1.442695, %v240_v26 }
  0xfa   :  { %339 = vpow2.f32 %v241_v27 }
  0xff   :  { %v334_v28 = vpop.eup %333 }
 0x100   :  { %v336_v29 = vpop.eup %335  ;;  %v190_v30 = vadd.f32 1.0, %v334_v28 }
 0x101   :  { %v138_v31 = vadd.f32 1.0, %v336_v29 }
 0x102   :  { %341 = vrcp.f32 %v190_v30 }
 0x103   :  { %343 = vrcp.f32 %v138_v31 }
 0x105   :  { %v338_v32 = vpop.eup %337 }
 0x106   :  { %v217_v33 = vadd.f32 1.0, %v338_v32  ;;  %v220_v36 = vmul.f32 -0.5, %v338_v32  ;;  %v223_v42 = vand.u32 2147483647, %v338_v32 }
 0x107   :  { %v340_v34 = vpop.eup %339 }
 0x108   :  { %345 = vlog2.f32 %v217_v33  ;;  %v243_v35 = vadd.f32 1.0, %v340_v34  ;;  %v246_v39 = vmul.f32 -0.5, %v340_v34  ;;  %v221_v41 = vadd.f32 1.0, %v220_v36 }
 0x109   :  { %v249_v47 = vand.u32 2147483647, %v340_v34  ;;  %vm224_vm3 = vcmp.lt.f32.partialorder %v223_v42, 0.0004427343 }
 0x10a   :  { %347 = vlog2.f32 %v243_v35  ;;  %v247_v44 = vadd.f32 1.0, %v246_v39  ;;  %v222_v46 = vmul.f32 %v338_v32, %v221_v41 }
 0x10b   :  { %vm250_vm5 = vcmp.lt.f32.partialorder %v249_v47, 0.0004427343 }
 0x10c   :  { %v248_v53 = vmul.f32 %v340_v34, %v247_v44 }
 0x10f   :  { %v490_v37 = vpop.eup %341 }
 0x110   :  { %v344_v38 = vpop.eup %343  ;;  %197 = vrot.lane.b32.xlu1 %v490_v37, %s428_s29 }
 0x111   :  { %v141_v40 = vmul.f32 0.5, %v344_v38 }
 0x113   :  { %143 = vst.msk [vmem:[#allocation7] sm:$0x3] %vm142_vm2, %v141_v40 }
 0x115   :  { %v346_v43 = vpop.eup %345 }
 0x116   :  { %v219_v45 = vmul.f32 0.6931472, %v346_v43 }
 0x117   :  { %v348_v49 = vpop.eup %347 }
 0x118   :  { %v225_v50 = vsel %vm224_vm3, %v222_v46, %v219_v45  ;;  %v245_v52 = vmul.f32 0.6931472, %v348_v49 }
 0x119   :  { %v226_v51 = vadd.f32 %v225_v50, %v210_v48 }
 0x11a   :  { %v251_v56 = vsel %vm250_vm5, %v248_v53, %v245_v52 }
 0x11b   :  { %v227_v55 = vsel %vm211_vm4, %v209_v19, %v226_v51  ;;  %v252_v58 = vadd.f32 %v251_v56, %v236_v54 }
 0x11c   :  { %v228_v57 = vsub.f32 0.0, %v227_v55 }
 0x11d   :  { %v253_v59 = vsel %vm237_vm6, %v235_v22, %v252_v58 }
 0x11e   :  { %230 = vrot.lane.b32.xlu0 %v228_v57, %s428_s29  ;;  %v254_v60 = vsub.f32 0.0, %v253_v59 }
 0x120   :  { %256 = vrot.lane.b32.xlu1 %v254_v60, %s428_s29 }
 0x162   :  { %v147_v61 = vpop.permute.xlu0 %146  ;;  %v155_v2 = vpop.permute.xlu1 %154 }
 0x163   :  { %v149_v62 = vadd.f32 %v147_v61, %v482_v14 }
 0x166   :  { %v151_v63 = vpop.permute.xlu0 %150 }
 0x167   :  { %v153_v1 = vadd.f32 %v151_v63, %v149_v62 }
 0x169   :  { %v157_v3 = vadd.f32 %v155_v2, %v153_v1 }
 0x16b   :  { %v158_v4 = vmax.f32 %v157_v3, 1e-24 }
 0x16d   :  { %349 = vrsqrt.f32 %v158_v4 }
 0x16e   :  { %351 = vtanh.f32 %v478_v12 }
 0x17a   :  { %v350_v5 = vpop.eup %349 }
 0x17b   :  { %170 = vrot.lane.b32.xlu1 %v350_v5, %s429_s30  ;;  %164 = vrot.lane.b32.xlu0 %v350_v5, %s422_s24  ;;  %v160_v6 = vmul.f32 %v350_v5, %v478_v12  ;;  %v352_v21 = vpop.eup %351 }
 0x17c   :  { %v183_v24 = vmul.f32 0.5, %v352_v21 }
 0x17d   :  { %162 = vst.msk [vmem:[#allocation7] sm:$0x3] %vm161_vm7, %v160_v6 }
 0x17f   :  { %176 = vrot.lane.b32.xlu0 %v350_v5, %s430_s5 }
 0x182   :  { %v198_v8 = vpop.permute.xlu1 %197 }
 0x183   :  { %vm200_vm8 = vcmp.lt.f32.partialorder %v195_v7, %v198_v8 }
 0x184   :  { %v289_v9 = vsel %vm200_vm8, 1.0, %v423_v0 }
 0x185   :  { %204 = vrot.lane.b32.xlu1 %v289_v9, %s431_s8  ;;  %v234_v11 = vsub.f32 1.0, %v289_v9 }
 0x190   :  { %v231_v10 = vpop.permute.xlu0 %230 }
 0x191   :  { %v233_v14 = vmul.f32 %v289_v9, %v231_v10 }
 0x192   :  { %v257_v13 = vpop.permute.xlu1 %256 }
 0x193   :  { %v259_v15 = vmul.f32 %v257_v13, %v234_v11 }
 0x195   :  { %v260_v16 = vadd.f32 %v259_v15, %v233_v14 }
 0x197   :  { %262 = vrot.lane.b32.xlu0 %v260_v16, %s432_s9 }
 0x1ed   :  { %v171_v17 = vpop.permute.xlu1 %170  ;;  %v165_v18 = vpop.permute.xlu0 %164 }
 0x1ee   :  { %v173_v19 = vmul.f32 %v171_v17, %v478_v12  ;;  %v167_v20 = vmul.f32 %v165_v18, %v478_v12 }
 0x1f0   :  { %169 = vst.msk [vmem:[#allocation7] sm:$0x3] %vm168_vm9, %v167_v20 }
 0x1f1   :  { %v177_v22 = vpop.permute.xlu0 %176  ;;  %175 = vst.msk [vmem:[#allocation7] sm:$0x3] %vm174_vm10, %v173_v19 }
 0x1f2   :  { %v179_v23 = vmul.f32 %v177_v22, %v478_v12 }
 0x1f4   :  { %181 = vst.msk [vmem:[#allocation7] sm:$0x3] %vm180_vm11, %v179_v23 }
 0x1f5   :  { %185 = vst.msk [vmem:[#allocation7] sm:$0x3] %vm184_vm12, %v183_v24 }
 0x1f6   :  { %194 = vst.msk [vmem:[#allocation7] sm:$0x3] %vm193_vm13, %v490_v37 }
 0x1f7   :  { %v205_v25 = vpop.permute.xlu1 %204 }
 0x1f8   :  { %208 = vst.msk [vmem:[#allocation7] sm:$0x3] %vm207_vm14, %v205_v25 }
 0x209   :  { %v263_v26 = vpop.permute.xlu0 %262 }
 0x20a   :  { %266 = vst.msk [vmem:[#allocation7] sm:$0x3] %vm265_vm15, %v263_v26 }
 0x20b   :  { %268 = vst.msk [vmem:[#allocation7] sm:$0x3] %vm267_vm0, %v423_v0 }
 0x20c   :  { %404 = shalt.err (!%p401_p0)
}
 0x20d   :  { %278 = dma.vmem_to_hbm [thread:$0]  %s276_s10, 32, %s516_s4, [#allocation4]  }
 0x20e   :  { %417 = dma.done.wait [#allocation4], 32  }
 0x20f   :  { %418 = vsyncadd [#allocation4], 4294967264 }
 0x210   :  { %282 = vsyncpa [#allocation3], 1 }
 0x211   :  { %283 = vsyncpa [#allocation6], 1 }
 0x212   :  { %284 = vsyncpa [#allocation4], 1 }

</bundles_post_ra>
